<compile_context>
chip_gen: v6e
topology: v6e:2x2x1
jax: 0.10.0
libtpu: 0.0.40
codegen_flags: <defaults>
</compile_context>

<pallas_src>
import math
import functools

import jax
import jax.numpy as jnp
from jax import lax
from jax.experimental import pallas as pl
from jax.experimental.pallas import tpu as pltpu


# ----------------------------------------------------------------------------
# Kernels
# ----------------------------------------------------------------------------
def _attn_kernel(q_ref, k_ref, v_ref, ctx_ref, attn_ref,
                 m_ref, l_ref, acc_ref, *, scale, num_kv):
    """Two-sweep kv axis: sweep 1 builds (m, l); sweep 2 emits normalized
    attention chunks and accumulates context."""
    j = pl.program_id(2)

    @pl.when(j == 0)
    def _init():
        m_ref[...] = jnp.full_like(m_ref, -jnp.inf)
        l_ref[...] = jnp.zeros_like(l_ref)
        acc_ref[...] = jnp.zeros_like(acc_ref)

    # (tq, ck) scaled scores on the MXU; contract the last dims of Q and K
    # directly (no XLU transpose of K); accumulate in f32, scale in f32.
    s = lax.dot_general(
        q_ref[0], k_ref[0],
        dimension_numbers=(((1,), (1,)), ((), ())),
        preferred_element_type=jnp.float32,
    ) * scale

    @pl.when(j < num_kv)
    def _sweep1():  # online running max / denominator
        m_prev = m_ref[...]
        m_new = jnp.maximum(m_prev, jnp.max(s, axis=-1, keepdims=True))
        l_ref[...] = (jnp.exp(m_prev - m_new) * l_ref[...]
                      + jnp.sum(jnp.exp(s - m_new), axis=-1, keepdims=True))
        m_ref[...] = m_new

    @pl.when(j >= num_kv)
    def _sweep2():  # exactly-normalized probabilities, context accumulation
        p = jnp.exp(s - m_ref[...]) / l_ref[...]          # (tq, ck) f32
        attn_ref[0] = p.astype(attn_ref.dtype)
        v = v_ref[0]
        acc_ref[...] += lax.dot_general(
            p.astype(v.dtype), v,
            dimension_numbers=(((1,), (0,)), ((), ())),
            preferred_element_type=jnp.float32,
        )

    @pl.when(j == 2 * num_kv - 1)
    def _finalize():
        ctx_ref[0] = acc_ref[...].astype(ctx_ref.dtype)


def _ctx_kernel(q_ref, k_ref, v_ref, ctx_ref,
                m_ref, l_ref, acc_ref, *, scale, num_kv):
    """Context-only fast path: single-sweep flash-style online softmax."""
    j = pl.program_id(2)

    @pl.when(j == 0)
    def _init():
        m_ref[...] = jnp.full_like(m_ref, -jnp.inf)
        l_ref[...] = jnp.zeros_like(l_ref)
        acc_ref[...] = jnp.zeros_like(acc_ref)

    s = lax.dot_general(
        q_ref[0], k_ref[0],
        dimension_numbers=(((1,), (1,)), ((), ())),
        preferred_element_type=jnp.float32,
    ) * scale

    m_prev = m_ref[...]
    m_new = jnp.maximum(m_prev, jnp.max(s, axis=-1, keepdims=True))
    alpha = jnp.exp(m_prev - m_new)
    p = jnp.exp(s - m_new)
    l_ref[...] = alpha * l_ref[...] + jnp.sum(p, axis=-1, keepdims=True)
    v = v_ref[0]
    acc_ref[...] = alpha * acc_ref[...] + lax.dot_general(
        p.astype(v.dtype), v,
        dimension_numbers=(((1,), (0,)), ((), ())),
        preferred_element_type=jnp.float32,
    )
    m_ref[...] = m_new

    @pl.when(j == num_kv - 1)
    def _finalize():
        ctx_ref[0] = (acc_ref[...]
                      * pl.reciprocal(l_ref[...], approx=True)).astype(ctx_ref.dtype)


# ----------------------------------------------------------------------------
# Tile / VMEM budgeting
# ----------------------------------------------------------------------------
def _vmem_capacity_bytes():
    try:
        cap = getattr(pltpu.get_tpu_info(), "vmem_capacity_bytes", None)
        if cap:
            return int(cap)
    except Exception:
        pass
    return 64 << 20  # conservative fallback (v7x per-TensorCore VMEM)


def _vmem_footprint(tq, ck, D, Dv, isz):
    # double-buffered pipelined blocks: q, k, v, ctx out, attn-chunk out
    blocks = 2 * isz * (tq * D + ck * D + ck * Dv + tq * Dv + tq * ck)
    # ~3 live f32 (tq, ck) temporaries (scores, exp, dtype-cast copies)
    temps = 3 * 4 * tq * ck
    # scratch accumulators: m, l (lane-padded to 128), acc
    scratch = 2 * 4 * tq * 128 + 4 * tq * max(Dv, 128)
    return blocks + temps + scratch


def _select_tiles(Tq, Tk, D, Dv, isz, budget):
    # q tile floored at 128 (whole Tq when shorter); kv chunk a multiple of 256
    # (fills the v6e/v7x 256-wide MXU), largest combo that fits the budget.
    q_cands = [c for c in (1024, 512, 256, 128) if c <= Tq and Tq % c == 0] or [Tq]
    k_cands = [c for c in (2048, 1024, 512, 256) if c <= Tk and Tk % c == 0] or [Tk]
    for tq in q_cands:
        for ck in k_cands:
            if _vmem_footprint(tq, ck, D, Dv, isz) <= budget:
                return tq, ck
    return q_cands[-1], k_cands[-1]


# ----------------------------------------------------------------------------
# Wrapper
# ----------------------------------------------------------------------------
def scaled_dot_product_attention(query, key, value, *, dim=None,
                                 return_attn=True, tile_q=None, tile_k=None):
    """Pallas implementation of ScaledDotProductAttention.forward
    (mask=None, eval-mode dropout). Returns (context, attn); attn is None
    when return_attn=False (context-only fast path).
    tile_q / tile_k are test hooks overriding the automatic tile selection."""
    B, Tq, D = query.shape
    Bk, Tk, Dk = key.shape
    Bv, Tkv, Dv = value.shape
    assert B == Bk == Bv and D == Dk and Tk == Tkv
    if dim is None:
        dim = D
    scale = 1.0 / math.sqrt(dim)

    out_dtype = query.dtype
    isz = jnp.dtype(out_dtype).itemsize

    cap = _vmem_capacity_bytes()
    budget = int(cap * 0.6)
    tq, ck = _select_tiles(Tq, Tk, D, Dv, isz, budget)
    if tile_q is not None:
        tq = tile_q
    if tile_k is not None:
        ck = tile_k
    assert Tq % tq == 0 and Tk % ck == 0
    num_q = Tq // tq
    num_kv = Tk // ck

    # v7x megacore: make sure the parallel grid axes have >= 2 points.
    if B * num_q < 2 and tq % 16 == 0:
        tq //= 2
        num_q = Tq // tq

    need = _vmem_footprint(tq, ck, D, Dv, isz)
    vmem_limit = int(min(int(0.8 * cap), max(int(1.25 * need) + (4 << 20), 32 << 20)))

    # kv-chunk index helpers (plain constants when there is a single chunk).
    if num_kv == 1:
        kv_chunk = lambda j: 0          # noqa: E731
        out_chunk = lambda j: 0         # noqa: E731
    else:
        kv_chunk = lambda j: j % num_kv                      # noqa: E731
        out_chunk = lambda j: jnp.maximum(j - num_kv, 0)     # noqa: E731

    q_spec = pl.BlockSpec((1, tq, D), lambda b, i, j: (b, i, 0))
    k_spec = pl.BlockSpec((1, ck, D), lambda b, i, j: (b, kv_chunk(j), 0))
    ctx_spec = pl.BlockSpec((1, tq, Dv), lambda b, i, j: (b, i, 0))

    scratch = [
        pltpu.VMEM((tq, 1), jnp.float32),   # running max m
        pltpu.VMEM((tq, 1), jnp.float32),   # running denominator l
        pltpu.VMEM((tq, Dv), jnp.float32),  # context accumulator
    ]
    cp = pltpu.CompilerParams(
        dimension_semantics=("parallel", "parallel", "arbitrary"),
        vmem_limit_bytes=vmem_limit,
    )

    if return_attn:
        # V only consumed in sweep 2; pin its index during sweep 1 so it is not
        # re-fetched. attn blocks stay pinned during sweep 1 and are each
        # written exactly once (contiguous residency) during sweep 2.
        v_spec = pl.BlockSpec((1, ck, Dv), lambda b, i, j: (b, out_chunk(j), 0))
        attn_spec = pl.BlockSpec((1, tq, ck), lambda b, i, j: (b, i, out_chunk(j)))
        kernel = functools.partial(_attn_kernel, scale=scale, num_kv=num_kv)
        ctx, attn = pl.pallas_call(
            kernel,
            out_shape=(
                jax.ShapeDtypeStruct((B, Tq, Dv), out_dtype),
                jax.ShapeDtypeStruct((B, Tq, Tk), out_dtype),
            ),
            grid_spec=pltpu.PrefetchScalarGridSpec(
                num_scalar_prefetch=0,
                grid=(B, num_q, 2 * num_kv),
                in_specs=[q_spec, k_spec, v_spec],
                out_specs=(ctx_spec, attn_spec),
                scratch_shapes=scratch,
            ),
            compiler_params=cp,
        )(query, key, value)
        return ctx, attn

    v_spec = pl.BlockSpec((1, ck, Dv), lambda b, i, j: (b, kv_chunk(j), 0))
    kernel = functools.partial(_ctx_kernel, scale=scale, num_kv=num_kv)
    ctx = pl.pallas_call(
        kernel,
        out_shape=jax.ShapeDtypeStruct((B, Tq, Dv), out_dtype),
        grid_spec=pltpu.PrefetchScalarGridSpec(
            num_scalar_prefetch=0,
            grid=(B, num_q, num_kv),
            in_specs=[q_spec, k_spec, v_spec],
            out_specs=ctx_spec,
            scratch_shapes=scratch,
        ),
        compiler_params=cp,
    )(query, key, value)
    return ctx, None


# ----------------------------------------------------------------------------
# Reference & self-test
# ----------------------------------------------------------------------------
def _reference(query, key, value, dim):
    score = jnp.einsum("bqd,bkd->bqk", query, key) / math.sqrt(dim)
    attn = jax.nn.softmax(score, axis=-1)
    ctx = jnp.einsum("bqk,bkd->bqd", attn, value)
    return ctx, attn


if __name__ == "__main__":
    root = jax.random.PRNGKey(0)

    # Case 1: small shapes matching the module (batch=2, seq=8, hidden=32).
    B, Tq, Tk, D = 2, 8, 8, 32
    kq, kk, kv = jax.random.split(root, 3)
    q1 = jax.random.normal(kq, (B, Tq, D), dtype=jnp.float32)
    k1 = jax.random.normal(kk, (B, Tk, D), dtype=jnp.float32)
    v1 = jax.random.normal(kv, (B, Tk, D), dtype=jnp.float32)

    ctx1, attn1 = scaled_dot_product_attention(q1, k1, v1, dim=D)
    jax.block_until_ready((ctx1, attn1))
    ctx1_r, attn1_r = _reference(q1, k1, v1, D)
    assert jnp.allclose(ctx1, ctx1_r, rtol=1e-3, atol=1e-4)
    assert jnp.allclose(attn1, attn1_r, rtol=1e-3, atol=1e-4)

    # Case 2: exercises multi-chunk online softmax + both kv sweeps.
    B2, Tq2, Tk2, D2 = 2, 32, 256, 32
    q2 = jax.random.normal(jax.random.fold_in(root, 1), (B2, Tq2, D2), jnp.float32)
    k2 = jax.random.normal(jax.random.fold_in(root, 2), (B2, Tk2, D2), jnp.float32)
    v2 = jax.random.normal(jax.random.fold_in(root, 3), (B2, Tk2, D2), jnp.float32)

    ctx2, attn2 = scaled_dot_product_attention(q2, k2, v2, dim=D2,
                                               tile_q=16, tile_k=128)
    jax.block_until_ready((ctx2, attn2))
    ctx2_r, attn2_r = _reference(q2, k2, v2, D2)
    assert jnp.allclose(ctx2, ctx2_r, rtol=1e-3, atol=1e-4)
    assert jnp.allclose(attn2, attn2_r, rtol=1e-3, atol=1e-4)

    # Case 3: context-only fast path (approx reciprocal -> looser tolerance).
    ctx3, _ = scaled_dot_product_attention(q2, k2, v2, dim=D2, return_attn=False,
                                           tile_q=16, tile_k=128)
    jax.block_until_ready(ctx3)
    assert jnp.allclose(ctx3, ctx2_r, rtol=2e-3, atol=2e-3)

    print("KERNEL_OK")
</pallas_src>

<mosaic_0001>
module attributes {stable_mosaic.version = 11 : i64} {
  func.func @_attn_kernel(%arg0: i32, %arg1: i32, %arg2: i32, %arg3: memref<1x8x32xf32, #tpu.memory_space<vmem>>, %arg4: memref<1x8x32xf32, #tpu.memory_space<vmem>>, %arg5: memref<1x8x32xf32, #tpu.memory_space<vmem>>, %arg6: memref<1x8x32xf32, #tpu.memory_space<vmem>>, %arg7: memref<1x8x8xf32, #tpu.memory_space<vmem>>, %arg8: memref<8x1xf32, #tpu.memory_space<vmem>>, %arg9: memref<8x1xf32, #tpu.memory_space<vmem>>, %arg10: memref<8x32xf32, #tpu.memory_space<vmem>>) attributes {dimension_semantics = [#tpu.dimension_semantics<parallel>, #tpu.dimension_semantics<parallel>, #tpu.dimension_semantics<arbitrary>], iteration_bounds = array<i64: 2, 1, 2>, scalar_prefetch = 0 : i64, scratch_operands = 3 : i64, tpu.core_type = #tpu.core_type<tc>, window_params = [{transform_indices = @transform_0, window_bounds = array<i64: 1, 8, 32>}, {transform_indices = @transform_1, window_bounds = array<i64: 1, 8, 32>}, {transform_indices = @transform_2, window_bounds = array<i64: 1, 8, 32>}, {transform_indices = @transform_3, window_bounds = array<i64: 1, 8, 32>}, {transform_indices = @transform_4, window_bounds = array<i64: 1, 8, 8>}]} {
    %c0_i32 = arith.constant 0 : i32
    %0 = arith.cmpi eq, %arg2, %c0_i32 : i32
    %1 = arith.extui %0 : i1 to i32
    %c0_i32_0 = arith.constant 0 : i32
    %2 = arith.cmpi ne, %1, %c0_i32_0 : i32
    scf.if %2 {
      %cst_12 = arith.constant 0xFF800000 : f32
      %19 = vector.broadcast %cst_12 : f32 to vector<8x1xf32>
      %c0_13 = arith.constant 0 : index
      %c0_14 = arith.constant 0 : index
      %20 = vector.load %arg8[%c0_13, %c0_14] : memref<8x1xf32, #tpu.memory_space<vmem>>, vector<8x1xf32>
      tpu.vector_store %arg8[%c0_13, %c0_14], %19 {strides = array<i32>} : memref<8x1xf32, #tpu.memory_space<vmem>>, vector<8x1xf32>,
      %cst_15 = arith.constant 0.000000e+00 : f32
      %21 = vector.broadcast %cst_15 : f32 to vector<8x1xf32>
      %c0_16 = arith.constant 0 : index
      %c0_17 = arith.constant 0 : index
      %22 = vector.load %arg9[%c0_16, %c0_17] : memref<8x1xf32, #tpu.memory_space<vmem>>, vector<8x1xf32>
      tpu.vector_store %arg9[%c0_16, %c0_17], %21 {strides = array<i32>} : memref<8x1xf32, #tpu.memory_space<vmem>>, vector<8x1xf32>,
      %cst_18 = arith.constant 0.000000e+00 : f32
      %23 = vector.broadcast %cst_18 : f32 to vector<8x32xf32>
      %c0_19 = arith.constant 0 : index
      %c0_20 = arith.constant 0 : index
      %24 = vector.load %arg10[%c0_19, %c0_20] : memref<8x32xf32, #tpu.memory_space<vmem>>, vector<8x32xf32>
      tpu.vector_store %arg10[%c0_19, %c0_20], %23 {strides = array<i32>} : memref<8x32xf32, #tpu.memory_space<vmem>>, vector<8x32xf32>,
    } else {
    }
    %c0 = arith.constant 0 : index
    %c0_1 = arith.constant 0 : index
    %c0_2 = arith.constant 0 : index
    %3 = vector.load %arg3[%c0, %c0_1, %c0_2] : memref<1x8x32xf32, #tpu.memory_space<vmem>>, vector<1x8x32xf32>
    %4 = vector.shape_cast %3 : vector<1x8x32xf32> to vector<8x32xf32>
    %c0_3 = arith.constant 0 : index
    %c0_4 = arith.constant 0 : index
    %c0_5 = arith.constant 0 : index
    %5 = vector.load %arg4[%c0_3, %c0_4, %c0_5] : memref<1x8x32xf32, #tpu.memory_space<vmem>>, vector<1x8x32xf32>
    %6 = vector.shape_cast %5 : vector<1x8x32xf32> to vector<8x32xf32>
    %cst = arith.constant dense<0.000000e+00> : vector<8x8xf32>
    %7 = tpu.matmul %4, %6, %cst {dimension_numbers = #tpu.dot_dimension_numbers<[1], [1], [0], [0], [0, 0, 1, 0], [], []>} : vector<8x32xf32>, vector<8x32xf32>, vector<8x8xf32> -> vector<8x8xf32>
    %cst_6 = arith.constant 0.176776692 : f32
    %8 = vector.broadcast %cst_6 : f32 to vector<8x8xf32>
    %9 = arith.mulf %7, %8 : vector<8x8xf32>
    %c1_i32 = arith.constant 1 : i32
    %10 = arith.cmpi slt, %arg2, %c1_i32 : i32
    %11 = arith.extui %10 : i1 to i32
    %c0_i32_7 = arith.constant 0 : i32
    %12 = arith.cmpi ne, %11, %c0_i32_7 : i32
    scf.if %12 {
      %c0_12 = arith.constant 0 : index
      %c0_13 = arith.constant 0 : index
      %19 = vector.load %arg8[%c0_12, %c0_13] : memref<8x1xf32, #tpu.memory_space<vmem>>, vector<8x1xf32>
      %cst_14 = arith.constant dense<0xFF800000> : vector<8xf32>
      %20 = vector.multi_reduction <maximumf>, %9, %cst_14 [1] : vector<8x8xf32> to vector<8xf32>
      %21 = vector.shape_cast %20 : vector<8xf32> to vector<8x1xf32>
      %22 = arith.maximumf %19, %21 : vector<8x1xf32>
      %23 = arith.subf %19, %22 : vector<8x1xf32>
      %24 = math.exp %23 : vector<8x1xf32>
      %c0_15 = arith.constant 0 : index
      %c0_16 = arith.constant 0 : index
      %25 = vector.load %arg9[%c0_15, %c0_16] : memref<8x1xf32, #tpu.memory_space<vmem>>, vector<8x1xf32>
      %26 = arith.mulf %24, %25 : vector<8x1xf32>
      %27 = vector.broadcast %22 : vector<8x1xf32> to vector<8x8xf32>
      %28 = arith.subf %9, %27 : vector<8x8xf32>
      %29 = math.exp %28 : vector<8x8xf32>
      %cst_17 = arith.constant dense<0.000000e+00> : vector<8xf32>
      %30 = vector.multi_reduction <add>, %29, %cst_17 [1] : vector<8x8xf32> to vector<8xf32>
      %31 = vector.shape_cast %30 : vector<8xf32> to vector<8x1xf32>
      %32 = arith.addf %26, %31 : vector<8x1xf32>
      %c0_18 = arith.constant 0 : index
      %c0_19 = arith.constant 0 : index
      %33 = vector.load %arg9[%c0_18, %c0_19] : memref<8x1xf32, #tpu.memory_space<vmem>>, vector<8x1xf32>
      tpu.vector_store %arg9[%c0_18, %c0_19], %32 {strides = array<i32>} : memref<8x1xf32, #tpu.memory_space<vmem>>, vector<8x1xf32>,
      %c0_20 = arith.constant 0 : index
      %c0_21 = arith.constant 0 : index
      %34 = vector.load %arg8[%c0_20, %c0_21] : memref<8x1xf32, #tpu.memory_space<vmem>>, vector<8x1xf32>
      tpu.vector_store %arg8[%c0_20, %c0_21], %22 {strides = array<i32>} : memref<8x1xf32, #tpu.memory_space<vmem>>, vector<8x1xf32>,
    } else {
    }
    %c1_i32_8 = arith.constant 1 : i32
    %13 = arith.cmpi sge, %arg2, %c1_i32_8 : i32
    %14 = arith.extui %13 : i1 to i32
    %c0_i32_9 = arith.constant 0 : i32
    %15 = arith.cmpi ne, %14, %c0_i32_9 : i32
    scf.if %15 {
      %c0_12 = arith.constant 0 : index
      %c0_13 = arith.constant 0 : index
      %19 = vector.load %arg8[%c0_12, %c0_13] : memref<8x1xf32, #tpu.memory_space<vmem>>, vector<8x1xf32>
      %20 = vector.broadcast %19 : vector<8x1xf32> to vector<8x8xf32>
      %21 = arith.subf %9, %20 : vector<8x8xf32>
      %22 = math.exp %21 : vector<8x8xf32>
      %c0_14 = arith.constant 0 : index
      %c0_15 = arith.constant 0 : index
      %23 = vector.load %arg9[%c0_14, %c0_15] : memref<8x1xf32, #tpu.memory_space<vmem>>, vector<8x1xf32>
      %24 = vector.broadcast %23 : vector<8x1xf32> to vector<8x8xf32>
      %25 = arith.divf %22, %24 : vector<8x8xf32>
      %c0_16 = arith.constant 0 : index
      %c0_17 = arith.constant 0 : index
      %c0_18 = arith.constant 0 : index
      %26 = vector.load %arg7[%c0_16, %c0_17, %c0_18] : memref<1x8x8xf32, #tpu.memory_space<vmem>>, vector<1x8x8xf32>
      %27 = vector.shape_cast %26 : vector<1x8x8xf32> to vector<8x8xf32>
      %28 = vector.shape_cast %25 : vector<8x8xf32> to vector<1x8x8xf32>
      tpu.vector_store %arg7[%c0_16, %c0_17, %c0_18], %28 {strides = array<i32>} : memref<1x8x8xf32, #tpu.memory_space<vmem>>, vector<1x8x8xf32>,
      %c0_19 = arith.constant 0 : index
      %c0_20 = arith.constant 0 : index
      %c0_21 = arith.constant 0 : index
      %29 = vector.load %arg5[%c0_19, %c0_20, %c0_21] : memref<1x8x32xf32, #tpu.memory_space<vmem>>, vector<1x8x32xf32>
      %30 = vector.shape_cast %29 : vector<1x8x32xf32> to vector<8x32xf32>
      %c0_22 = arith.constant 0 : index
      %c0_23 = arith.constant 0 : index
      %31 = vector.load %arg10[%c0_22, %c0_23] : memref<8x32xf32, #tpu.memory_space<vmem>>, vector<8x32xf32>
      %cst_24 = arith.constant dense<0.000000e+00> : vector<8x32xf32>
      %32 = tpu.matmul %25, %30, %cst_24 {dimension_numbers = #tpu.dot_dimension_numbers<[1], [0], [0], [1], [0, 0, 1, 1], [], []>} : vector<8x8xf32>, vector<8x32xf32>, vector<8x32xf32> -> vector<8x32xf32>
      %33 = arith.addf %31, %32 : vector<8x32xf32>
      %c0_25 = arith.constant 0 : index
      %c0_26 = arith.constant 0 : index
      %34 = vector.load %arg10[%c0_25, %c0_26] : memref<8x32xf32, #tpu.memory_space<vmem>>, vector<8x32xf32>
      tpu.vector_store %arg10[%c0_25, %c0_26], %33 {strides = array<i32>} : memref<8x32xf32, #tpu.memory_space<vmem>>, vector<8x32xf32>,
    } else {
    }
    %c1_i32_10 = arith.constant 1 : i32
    %16 = arith.cmpi eq, %arg2, %c1_i32_10 : i32
    %17 = arith.extui %16 : i1 to i32
    %c0_i32_11 = arith.constant 0 : i32
    %18 = arith.cmpi ne, %17, %c0_i32_11 : i32
    scf.if %18 {
      %c0_12 = arith.constant 0 : index
      %c0_13 = arith.constant 0 : index
      %19 = vector.load %arg10[%c0_12, %c0_13] : memref<8x32xf32, #tpu.memory_space<vmem>>, vector<8x32xf32>
      %c0_14 = arith.constant 0 : index
      %c0_15 = arith.constant 0 : index
      %c0_16 = arith.constant 0 : index
      %20 = vector.load %arg6[%c0_14, %c0_15, %c0_16] : memref<1x8x32xf32, #tpu.memory_space<vmem>>, vector<1x8x32xf32>
      %21 = vector.shape_cast %20 : vector<1x8x32xf32> to vector<8x32xf32>
      %22 = vector.shape_cast %19 : vector<8x32xf32> to vector<1x8x32xf32>
      tpu.vector_store %arg6[%c0_14, %c0_15, %c0_16], %22 {strides = array<i32>} : memref<1x8x32xf32, #tpu.memory_space<vmem>>, vector<1x8x32xf32>,
    } else {
    }
    return
  }
  func.func @transform_0(%arg0: i32, %arg1: i32, %arg2: i32) -> (i32, i32, i32) {
    %c0_i32 = arith.constant 0 : i32
    %c0_i32_0 = arith.constant 0 : i32
    return %arg0, %arg1, %c0_i32 : i32, i32, i32
  }
  func.func @transform_1(%arg0: i32, %arg1: i32, %arg2: i32) -> (i32, i32, i32) {
    %c0_i32 = arith.constant 0 : i32
    %c0_i32_0 = arith.constant 0 : i32
    %c0_i32_1 = arith.constant 0 : i32
    return %arg0, %c0_i32, %c0_i32_0 : i32, i32, i32
  }
  func.func @transform_2(%arg0: i32, %arg1: i32, %arg2: i32) -> (i32, i32, i32) {
    %c0_i32 = arith.constant 0 : i32
    %c0_i32_0 = arith.constant 0 : i32
    %c0_i32_1 = arith.constant 0 : i32
    return %arg0, %c0_i32, %c0_i32_0 : i32, i32, i32
  }
  func.func @transform_3(%arg0: i32, %arg1: i32, %arg2: i32) -> (i32, i32, i32) {
    %c0_i32 = arith.constant 0 : i32
    %c0_i32_0 = arith.constant 0 : i32
    return %arg0, %arg1, %c0_i32 : i32, i32, i32
  }
  func.func @transform_4(%arg0: i32, %arg1: i32, %arg2: i32) -> (i32, i32, i32) {
    %c0_i32 = arith.constant 0 : i32
    %c0_i32_0 = arith.constant 0 : i32
    return %arg0, %arg1, %c0_i32 : i32, i32, i32
  }
}

</mosaic_0001>

<bundles_post_ra>
// kernel: tpu_custom_call.1
= control target key start
LH: loop header
LB: loop body
LE: loop exit
PB: predicated region body
PF: predicated region fallthrough
CT: control target
= control target key end

     0   :  { %s1409_s0 = inlined_call_operand.hbm [shape: f32[2,8,32], index: 0, kind: input, shape index: {}]   ;;  %s1410_s1 = inlined_call_operand.hbm [shape: f32[2,8,32], index: 1, kind: input, shape index: {}]   ;;  %s1411_s2 = inlined_call_operand.hbm [shape: f32[2,8,32], index: 2, kind: input, shape index: {}]   ;;  %s1412_s3 = inlined_call_operand.hbm [shape: f32[2,8,32], index: 3, kind: output, shape index: {0}]   ;;  %s1413_s4 = inlined_call_operand.hbm [shape: f32[2,8,8], index: 4, kind: output, shape index: {1}]  }
   0x1   :  { %1419 = sst [smem:[#allocation24_spill]] %s1410_s1 }
   0x2   :  { %10 = vsyncpa [#allocation6], 0 }
   0x3   :  { %12 = vsyncpa [#allocation6 + $0x1], 0 }
   0x4   :  { %13 = vsyncpa [#allocation9], 0 }
   0x5   :  { %15 = vsyncpa [#allocation9 + $0x1], 0 }
   0x6   :  { %16 = vsyncpa [#allocation7], 0 }
   0x7   :  { %18 = vsyncpa [#allocation7 + $0x1], 0 }
   0x8   :  { %19 = vsyncpa [#allocation13], 0 }
   0x9   :  { %21 = vsyncpa [#allocation13 + $0x1], 0  ;;  %s1150_s15 = smov 0   ;;  %s1152_s16 = smov 0  }
   0xa   :  { %s1154_s17 = smov 0   ;;  %s1156_s18 = smov 0  }
   0xb   :  { %s1158_s19 = smov 0   ;;  %s1160_s20 = smov 0  }
   0xc   :  { %s1162_s21 = smov 0   ;;  %s1164_s22 = smov 0  }
   0xd LB: > { %1420 = sst [smem:[#allocation18_spill]] %s1102_s20  ;;  %s1191_s23 = sadd.s32 4294967295, %s1110_s22   ;;  %s1110_s22 = sphi %s1164_s22, %s27_s22   ;;  %s1106_s21 = sphi %s1162_s21, %s1439_s21   ;;  %s1102_s20 = sphi %s1160_s20, %s1438_s20   ;;  %s1098_s19 = sphi %s1158_s19, %s1437_s19   ;;  %s1094_s18 = sphi %s1156_s18, %s1436_s18   ;;  %s1090_s17 = sphi %s1154_s17, %s1442_s17   ;;  %s1086_s16 = sphi %s1152_s16, %s1441_s16   ;;  %s1082_s15 = sphi %s1150_s15, %s1440_s15  }
   0xe   : > { %1421 = sst [smem:[#allocation19_spill]] %s1106_s21  ;;  %s743_s24 = sadd.s32 4294967294, %s1110_s22  }
   0xf   : > { %s39_s25 = sadd.s32 1, %s1102_s20  ;;  %s46_s26 = sadd.s32 1, %s1106_s21 }
  0x10   : > { %p40_p0 = scmp.ge.s32.totalorder %s39_s25, 2  ;;  %s55_s27 = sadd.s32 1, %s1090_s17 }
  0x11   : > { %p62_p1 = scmp.ne.s32.totalorder %s1090_s17, %s1086_s16  ;;  %p63_p2 = scmp.eq.s32.totalorder %s1110_s22, 0 }
  0x12   : > { %s1444_s25 = smov (%p40_p0, %s39_s25), 0  ;;  %s1446_s26 = smov (!%p40_p0, %s46_s26), %s1106_s21 }
  0x13   : > { %1422 = sst [smem:[#allocation20_spill]] %s1444_s25  ;;  %p1203_p3 = por %p63_p2, %p62_p1 }
  0x14   : > { %p68_p4 = scmp.ne.s32.totalorder %s1086_s16, %s1082_s15  ;;  %p48_p5 = scmp.ge.s32.totalorder %s1446_s26, 2 }
  0x15   : > { %p69_p6 = scmp.eq.s32.totalorder %s1191_s23, 0  ;;  %p146_p7 = scmp.eq.s32.totalorder %s1191_s23, 3 }
  0x16   : > { %p152_p8 = scmp.eq.s32.totalorder %s743_s24, 3  ;;  %s1448_s26 = smov (%p48_p5, %s1446_s26), 0 }
  0x17   : > { %1424 = sst [smem:[#allocation21_spill]] %s1448_s26  ;;  %p1213_p9 = por %p69_p6, %p68_p4 }
  0x18   : > { %p1217_p10 = por %p146_p7, %p62_p1  ;;  %s50_s5 = ssub.s32 %s1106_s21, %s1448_s26 }
  0x19   : > { %p1223_p11 = por %p152_p8, %p68_p4  ;;  %p53_p12 = scmp.eq.s32.totalorder %s50_s5, 0 }
  0x1a   : > { %p812_p13 = scmp.lt.s32.totalorder %s1110_s22, 4  ;;  %s1414_s7 = sand.u32 1, %s1090_s17  }
  0x1b   : > { %s1427_s6 = scalar_select %p1223_p11, 1, 0 }
  0x1c   : > { %s1230_s8 = scalar_select %p53_p12, %s1090_s17, %s55_s27  }
  0x1d   : > { %1428 = sst [smem:[#allocation22_spill]] %s1427_s6  ;;  %s1234_s9 = sshll.u32 %s1414_s7, 3 }
  0x1e   : > { %1429 = sst [smem:[#allocation23_spill]] %s1230_s8  ;;  %s1237_s10 = sshll.u32 %s1106_s21, 7 }
  0x1f   : > { %p1241_p0 = pnand %p812_p13, %p1203_p3  ;;  %s219_s12 = sand.u32 1, %s1110_s22  }
  0x20   : > { %s1431_s1 = sld [smem:[#allocation24_spill]]  ;;  %s223_s27 = scalar_lea.vmem [#allocation8], %s1234_s9 }
  0x21   : > { %s230_s5 = sshll.u32 %s223_s27, 4  ;;  %p752_p1 = scmp.ge.s32.totalorder %s1110_s22, 1  ;;  %s231_s5 = int_to_ptr.vmem [resolvable:$true] %s230_s5 }
  0x22   : > { %p253_p2 = scmp.lt.s32.totalorder %s1110_s22, 5  ;;  %s1253_s7 = scalar_lea.sflag [#allocation9], %s219_s12 }
  0x23   : > { %p898_p4 = pneg %p1241_p0  ;;  %s909_s28 = scalar_lea.vmem %s231_s5, 128 }
  0x24   : > { %p910_p3 = scmp.ne.s32.totalorder %s231_s5, %s909_s28  ;;  %s1112_s26 = smov [#allocation8]  }
  0x25   : > { %s914_s25 = sshll.u32 %s1112_s26, 4  ;;  %s915_s25 = int_to_ptr.vmem [resolvable:$false] %s914_s25 }
  0x26   : > { %s228_s24 = scalar_lea.hbm %s1431_s1, %s1237_s10  ;;  %p912_p5 = pnand %p910_p3, %p898_p4 }
  0x27   : > { %s916_s13 = scalar_lea.vmem %s915_s25, 256  ;;  %p917_p7 = scmp.lt.s32.totalorder %s231_s5, %s915_s25 }
  0x28   : > { %p913_p6 = pneg %p912_p5  ;;  %p918_p8 = scmp.lt.s32.totalorder %s916_s13, %s909_s28 }
  0x2a   : > { %p919_p12 = por %p918_p8, %p917_p7 }
  0x2c   : > { %p920_p13 = pnand %p919_p12, %p913_p6 }
  0x2e   : > { %923 = shalt.err (!%p920_p13)
}
  0x2f   : > { %801 = dma.hbm_to_vmem [thread:$0]  (!%p1241_p0), %s228_s24, 128, %s231_s5, %s1253_s7  }
  0x30   : > { %p1267_p3 = pnand %p752_p1, %p253_p2  ;;  %s210_s14 = scalar_lea.hbm %s1409_s0, %s1237_s10 }
  0x31   : > { %s204_s27 = scalar_lea.vmem [#allocation5], %s1234_s9  ;;  %s246_s21 = scalar_lea.hbm %s1411_s2, %s1237_s10 }
  0x32   : > { %s212_s28 = sshll.u32 %s204_s27, 4  ;;  %s1433_s20 = sand.u32 1, %s1090_s17   ;;  %s213_s28 = int_to_ptr.vmem [resolvable:$true] %s212_s28 }
  0x33   : > { %s201_s8 = scalar_lea.sflag [#allocation6], %s1433_s20  ;;  %s937_s24 = scalar_lea.vmem %s213_s28, 128 }
  0x34   : > { %p938_p5 = scmp.ne.s32.totalorder %s213_s28, %s937_s24  ;;  %s1113_s5 = smov [#allocation5]  }
  0x35   : > { %s942_s6 = sshll.u32 %s1113_s5, 4  ;;  %s943_s6 = int_to_ptr.vmem [resolvable:$false] %s942_s6 }
  0x36   : > { %p940_p1 = pnand %p938_p5, %p898_p4  ;;  %s944_s25 = scalar_lea.vmem %s943_s6, 256 }
  0x37   : > { %p945_p6 = scmp.lt.s32.totalorder %s213_s28, %s943_s6  ;;  %p946_p7 = scmp.lt.s32.totalorder %s944_s25, %s937_s24 }
  0x38   : > { %p941_p2 = pneg %p940_p1 }
  0x39   : > { %p947_p8 = por %p946_p7, %p945_p6 }
  0x3b   : > { %p948_p12 = pnand %p947_p8, %p941_p2 }
  0x3d   : > { %951 = shalt.err (!%p948_p12)
}
  0x3e   : > { %798 = dma.hbm_to_vmem [thread:$0]  (!%p1241_p0), %s210_s14, 128, %s213_s28, %s201_s8  }
  0x3f   : > { %s241_s1 = scalar_lea.vmem [#allocation10], %s1234_s9  ;;  %s1114_s27 = smov [#allocation10]  }
  0x40   : > { %s248_s20 = sshll.u32 %s241_s1, 4  ;;  %s970_s6 = sshll.u32 %s1114_s27, 4  ;;  %s249_s20 = int_to_ptr.vmem [resolvable:$true] %s248_s20  ;;  %s971_s6 = int_to_ptr.vmem [resolvable:$false] %s970_s6 }
  0x41   : > { %s965_s12 = scalar_lea.vmem %s249_s20, 128  ;;  %s972_s13 = scalar_lea.vmem %s971_s6, 256 }
  0x42   : > { %p966_p13 = scmp.ne.s32.totalorder %s249_s20, %s965_s12  ;;  %p973_p2 = scmp.lt.s32.totalorder %s249_s20, %s971_s6 }
  0x43   : > { %p974_p6 = scmp.lt.s32.totalorder %s972_s13, %s965_s12 }
  0x44   : > { %p968_p5 = pnand %p966_p13, %p898_p4 }
  0x45   : > { %p975_p7 = por %p974_p6, %p973_p2 }
  0x46   : > { %p969_p1 = pneg %p968_p5 }
  0x48   : > { %p976_p8 = pnand %p975_p7, %p969_p1 }
  0x4a   : > { %979 = shalt.err (!%p976_p8)
}
  0x4b   : > { %804 = dma.hbm_to_vmem [thread:$0]  (!%p1241_p0), %s246_s21, 128, %s249_s20, %s1253_s7  }
  0x4c   : > { %257 = sbr.rel (%p1267_p3) target bundleno = 1127 (0x467), region = 32  ;;  %s1302_s14 = sand.u32 (!%p1267_p3), 1, %s1086_s16  }
  0x4d   : > { %s1305_s28 = sshll.u32 (!%p1267_p3), %s1302_s14, 3  ;;  %s260_s11 = scalar_lea.sflag (!%p1267_p3), [#allocation6], %s1302_s14 }
  0x4e   : > { %s263_s24 = scalar_lea.vmem (!%p1267_p3), [#allocation5], %s1305_s28 }
  0x51   : > { %1065 = dma.done.wait (%p1213_p9), %s260_s11, 128  }
  0x52   : > { %1067 = vsyncadd (%p1213_p9), %s260_s11, 4294967168  ;;  %s268_s21 = sand.u32 1, %s1191_s23   ;;  %s272_s10 = scalar_lea.vmem [#allocation8], %s1305_s28 }
  0x53   : > { %s269_s7 = scalar_lea.sflag [#allocation9], %s268_s21 }
  0x54   : > { %1069 = dma.done.wait (%p1213_p9), %s269_s7, 256  }
  0x55   : > { %1071 = vsyncadd (%p1213_p9), %s269_s7, 4294967040  ;;  %s281_s26 = scalar_lea.vmem [#allocation10], %s1305_s28  ;;  %s313_s5 = scalar_lea.vmem [#allocation11], %s1305_s28 }
  0x56   : > { %s320_s25 = scalar_lea.vmem [#allocation12], %s1305_s28  ;;  %p758_p0 = scmp.ne.s32.totalorder %s1094_s18, 0 }
  0x58   : > { %324 = sbr.rel (%p758_p0) target bundleno = 96 (0x60), region = 48 }
  0x5d   : > { %vm325_vm0 = vcmask 7168   ;;  %vm328_vm1 = vcmask 261120   ;;  %v1115_v0 = vmov -inf   ;;  %v1116_v1 = vmov 0.0  }
  0x5e   : > { %326 = vst.msk [vmem:[#allocation2] sm:$0xff] %vm325_vm0, %v1115_v0  ;;  %327 = vst.msk [vmem:[#allocation3] sm:$0xff] %vm325_vm0, %v1116_v1 }
  0x5f   : > { %329 = vst.msk [vmem:[#allocation4] sm:$0xff] %vm328_vm1, %v1116_v1 }
  0x60 PF: > { %v331_v2 = vld [vmem:[%s272_s10] sm:$0xff]  ;;  %vm332_vm2 = vcmask 261120   ;;  %v1117_v3 = vmov 0.0   ;;  %vm1118_vm3 = vmmov 0   ;;  %v330_v4 = vld [vmem:[%s263_s24] sm:$0xff]  ;;  %p761_p9 = scmp.ge.s32.totalorder %s1094_s18, 1 }
  0x61   : > { %775 = vmatprep.subr.mxu0 %v1117_v3  ;;  %777 = vmatprep.mubr.msk.f32.mxu0 %vm1118_vm3, %v1117_v3 }
  0x62   : > { %776 = vmatpush3.xpose.msk.msra.mxu0 %vm332_vm2, %v331_v2 }
  0x65   : > { %778 = vmatmul.mubr.msk.f32.vlgmr.msra.gmra.mxu0 %vm332_vm2, %v330_v4 }
 0x123   : > { %413 = sbr.rel (%p761_p9) target bundleno = 722 (0x2d2), region = 52 }
 0x125   : > { %v405_v5 = vpop.f32.mrf.mxu0 }
 0x126   : > { %v409_v6 = vmul.f32 0.17677669, %v405_v5 }
 0x127   : > { %v779_v7 = vpop.f32.mrf.mxu0 }
 0x128   : > { %vm415_vm4 = vcmask 64512   ;;  %v1119_v9 = vmov 0   ;;  %v414_v10 = vld [vmem:[#allocation2] sm:$0xff]  ;;  %vm437_vm5 = vcmask 7168   ;;  %v423_v21 = vld [vmem:[#allocation3] sm:$0xff] }
 0x129   : > { %v416_v8 = vsel %vm415_vm4, %v409_v6, -inf  ;;  %886 = vset.pattern.permute.xlu0 %v1119_v9 }
 0x12a   : > { %417 = vmax.xlane.f32.xlu0 %v416_v8 }
 0x1b3   : > { %v418_v11 = vpop.xlane.xlu0 %417 }
 0x1b4   : > { %v419_v12 = vmax.f32 %v414_v10, %v418_v11 }
 0x1b6   : > { %v420_v13 = vsub.f32 %v414_v10, %v419_v12  ;;  %439 = vst.msk [vmem:[#allocation2] sm:$0xff] %vm437_vm5, %v419_v12  ;;  %427 = vperm.xlu0 %886, %v419_v12  }
 0x1b8   : > { %v421_v19 = vmul.f32 1.442695, %v420_v13 }
 0x231   : > { %v428_v14 = vpop.permute.xlu0 %427 }
 0x232   : > { %v430_v15 = vsub.f32 %v409_v6, %v428_v14 }
 0x234   : > { %v431_v16 = vmul.f32 1.442695, %v430_v15 }
 0x236   : > { %887 = vpow2.f32 %v431_v16 }
 0x237   : > { %889 = vpow2.f32 %v421_v19 }
 0x243   : > { %v888_v17 = vpop.eup %887 }
 0x244   : > { %v433_v18 = vsel %vm415_vm4, %v888_v17, 0.0  ;;  %v890_v20 = vpop.eup %889 }
 0x245   : > { %434 = vadd.xlane.f32.xlu1 %v433_v18  ;;  %v424_v22 = vmul.f32 %v890_v20, %v423_v21 }
 0x2ce   : > { %v435_v23 = vpop.xlane.xlu1 %434 }
 0x2cf   : > { %v436_v24 = vadd.f32 %v435_v23, %v424_v22 }
 0x2d1   : > { %438 = vst.msk [vmem:[#allocation3] sm:$0xff] %vm437_vm5, %v436_v24 }
 0x2d2 PF: > { %p762_p4 = scmp.lt.s32.totalorder %s1094_s18, 1 }
 0x2d4   : > { %443 = sbr.rel (%p762_p4) target bundleno = 1072 (0x430), region = 56 }
 0x2d9   : > { %v444_v25 = vld [vmem:[#allocation2] sm:$0xff]  ;;  %v1120_v26 = vmov 0   ;;  %v453_v27 = vld [vmem:[#allocation3] sm:$0xff]  ;;  %v1121_v29 = vmov 0.0   ;;  %vm1122_vm6 = vmmov 0   ;;  %vm461_vm7 = vcmask 64512  }
 0x2da   : > { %891 = vset.pattern.permute.xlu0 %v1120_v26  ;;  %v463_v28 = vld [vmem:[%s281_s26] sm:$0xff]  ;;  %780 = vmatprep.subr.mxu0 %v1121_v29  ;;  %v464_v37 = vld [vmem:[#allocation4] sm:$0xff] }
 0x2db   : > { %447 = vperm.xlu0 %891, %v444_v25   ;;  %782 = vmatprep.mubr.msk.f32.mxu0 %vm1122_vm6, %v1121_v29 }
 0x2dc   : > { %781 = vmatpush3.msra.mxu0 %v463_v28 }
 0x2df   : > { %456 = vperm.xlu0 %891, %v453_v27  }
 0x356   : > { %v448_v30 = vpop.permute.xlu0 %447 }
 0x357   : > { %v450_v31 = vsub.f32 %v409_v6, %v448_v30 }
 0x359   : > { %v451_v32 = vmul.f32 1.442695, %v450_v31 }
 0x35a   : > { %v457_v33 = vpop.permute.xlu0 %456 }
 0x35b   : > { %892 = vpow2.f32 %v451_v32 }
 0x35c   : > { %894 = vrcp.f32 %v457_v33 }
 0x368   : > { %v893_v34 = vpop.eup %892 }
 0x369   : > { %v895_v35 = vpop.eup %894 }
 0x36a   : > { %v460_v36 = vmul.f32 %v895_v35, %v893_v34 }
 0x36c   : > { %462 = vst.msk [vmem:[%s320_s25] sm:$0xff] %vm461_vm7, %v460_v36  ;;  %783 = vmatmul.mubr.msk.f32.vlgmr.msra.gmra.mxu0 %vm461_vm7, %v460_v36 }
 0x42c   : > { %v534_v38 = vpop.f32.mrf.mxu0 }
 0x42d   : > { %v538_v39 = vadd.f32 %v534_v38, %v464_v37 }
 0x42e   : > { %v784_v40 = vpop.f32.mrf.mxu0 }
 0x42f   : > { %539 = vst.msk [vmem:[#allocation4] sm:$0xff] %vm332_vm2, %v538_v39 }
 0x430 PF: > { %p764_p3 = scmp.ne.s32.totalorder %s1094_s18, 1 }
 0x432   : > { %543 = sbr.rel (%p764_p3) target bundleno = 1081 (0x439), region = 60 }
 0x437   : > { %v544_v41 = vld [vmem:[#allocation4] sm:$0xff] }
 0x438   : > { %545 = vst.msk [vmem:[%s313_s5] sm:$0xff] %vm332_vm2, %v544_v41 }
 0x439 PF: > { %s767_s23 = sshll.u32 %s1098_s19, 7  ;;  %s566_s18 = sshll.u32 %s313_s5, 4  ;;  %s567_s18 = int_to_ptr.vmem [resolvable:$true] %s566_s18 }
 0x43a   : > { %s564_s20 = scalar_lea.hbm %s1412_s3, %s767_s23  ;;  %s547_s12 = scalar_lea.sflag [#allocation7], %s1302_s14 }
 0x43b   : > { %s980_s27 = scalar_lea.vmem %s567_s18, 128  ;;  %s1123_s6 = smov [#allocation11]  }
 0x43c   : > { %p981_p12 = scmp.ne.s32.totalorder %s567_s18, %s980_s27  ;;  %s984_s13 = sshll.u32 %s1123_s6, 4  ;;  %s985_s13 = int_to_ptr.vmem [resolvable:$false] %s984_s13 }
 0x43d   : > { %s986_s8 = scalar_lea.vmem %s985_s13, 256  ;;  %p987_p1 = scmp.lt.s32.totalorder %s567_s18, %s985_s13 }
 0x43e   : > { %p982_p13 = pnand %p981_p12, %p1217_p10  ;;  %p988_p2 = scmp.lt.s32.totalorder %s986_s8, %s980_s27 }
 0x440   : > { %p983_p5 = pneg %p982_p13  ;;  %p989_p6 = por %p988_p2, %p987_p1 }
 0x442   : > { %p990_p7 = pnand %p989_p6, %p983_p5 }
 0x444   : > { %993 = shalt.err (!%p990_p7)
}
 0x445   : > { %s994_s9 = scalar_lea.hbm %s564_s20, 128  ;;  %s998_s21 = scalar_lea.hbm %s1412_s3, 256 }
 0x446   : > { %p995_p8 = scmp.ne.s32.totalorder %s564_s20, %s994_s9  ;;  %p999_p4 = scmp.lt.s32.totalorder %s564_s20, %s1412_s3 }
 0x447   : > { %p1000_p3 = scmp.lt.s32.totalorder %s998_s21, %s994_s9 }
 0x448   : > { %p996_p0 = pnand %p995_p8, %p1217_p10 }
 0x449   : > { %p1001_p12 = por %p1000_p3, %p999_p4 }
 0x44a   : > { %p997_p9 = pneg %p996_p0 }
 0x44c   : > { %p1002_p13 = pnand %p1001_p12, %p997_p9 }
 0x44e   : > { %1005 = shalt.err (!%p1002_p13)
}
 0x44f   : > { %791 = dma.vmem_to_hbm [thread:$0]  (%p1217_p10), %s567_s18, 128, %s564_s20, %s547_s12  }
 0x450   : > { %s578_s29 = scalar_lea.hbm %s1413_s4, %s767_s23  ;;  %s580_s1 = sshll.u32 %s320_s25, 4  ;;  %s581_s1 = int_to_ptr.vmem [resolvable:$true] %s580_s1 }
 0x451   : > { %s552_s27 = scalar_lea.sflag [#allocation13], %s1302_s14  ;;  %s1006_s6 = scalar_lea.vmem %s581_s1, 128 }
 0x452   : > { %p1007_p5 = scmp.ne.s32.totalorder %s581_s1, %s1006_s6  ;;  %s1124_s13 = smov [#allocation12]  }
 0x453   : > { %s1010_s8 = sshll.u32 %s1124_s13, 4  ;;  %s1011_s8 = int_to_ptr.vmem [resolvable:$false] %s1010_s8 }
 0x454   : > { %p1008_p1 = pnand %p1007_p5, %p1217_p10  ;;  %s1012_s9 = scalar_lea.vmem %s1011_s8, 256 }
 0x455   : > { %p1013_p6 = scmp.lt.s32.totalorder %s581_s1, %s1011_s8  ;;  %p1014_p7 = scmp.lt.s32.totalorder %s1012_s9, %s1006_s6 }
 0x456   : > { %p1009_p2 = pneg %p1008_p1 }
 0x457   : > { %p1015_p8 = por %p1014_p7, %p1013_p6 }
 0x459   : > { %p1016_p0 = pnand %p1015_p8, %p1009_p2 }
 0x45b   : > { %1019 = shalt.err (!%p1016_p0)
}
 0x45c   : > { %s1020_s19 = scalar_lea.hbm %s578_s29, 128  ;;  %s1024_s25 = scalar_lea.hbm %s1413_s4, 256 }
 0x45d   : > { %p1021_p9 = scmp.ne.s32.totalorder %s578_s29, %s1020_s19  ;;  %p1025_p12 = scmp.lt.s32.totalorder %s578_s29, %s1413_s4 }
 0x45e   : > { %p1026_p13 = scmp.lt.s32.totalorder %s1024_s25, %s1020_s19 }
 0x45f   : > { %p1022_p4 = pnand %p1021_p9, %p1217_p10 }
 0x460   : > { %p1027_p5 = por %p1026_p13, %p1025_p12 }
 0x461   : > { %p1023_p3 = pneg %p1022_p4 }
 0x463   : > { %p1028_p1 = pnand %p1027_p5, %p1023_p3 }
 0x465   : > { %1031 = shalt.err (!%p1028_p1)
}
 0x466   : > { %792 = dma.vmem_to_hbm [thread:$0]  (%p1217_p10), %s581_s1, 128, %s578_s29, %s552_s27  }
 0x467 PF: > { %p813_p2 = scmp.ge.s32.totalorder %s1110_s22, 2  ;;  %s592_s12 = sand.u32 1, %s1082_s15  }
 0x468   : > { %s593_s11 = scalar_lea.sflag [#allocation7], %s592_s12 }
 0x469   : > { %p806_p6 = pnand %p813_p2, %p1223_p11 }
 0x46b   : > { %p807_p7 = pneg %p806_p6 }
 0x46d   : > { %1073 = dma.done.wait (%p807_p7), %s593_s11, 128  }
 0x46e   : > { %1075 = vsyncadd (%p807_p7), %s593_s11, 4294967168  ;;  %s602_s24 = scalar_lea.sflag [#allocation13], %s592_s12 }
 0x46f   : > { %1077 = dma.done.wait (%p807_p7), %s602_s24, 128  }
 0x470   : > { %1079 = vsyncadd (%p807_p7), %s602_s24, 4294967168  ;;  %s27_s22 = sadd.s32 1, %s1110_s22   ;;  %s1435_s30 = sld [smem:[#allocation23_spill]] }
 0x471   : > { %p24_p8 = scmp.ge.s32.totalorder %s27_s22, 6   ;;  %s1436_s18 = sld [smem:[#allocation18_spill]] }
 0x472   : > { %s1437_s19 = sld [smem:[#allocation19_spill]]  ;;  %s1440_s15 = smov %s1086_s16 }
 0x473   : > { %s1438_s20 = sld [smem:[#allocation20_spill]]  ;;  %s1441_s16 = smov %s1090_s17 }
 0x474   : > { %s1439_s21 = sld [smem:[#allocation21_spill]]  ;;  %26 = sbr.rel (!%p24_p8) target bundleno = 13 (0xd), region = 134 }
 0x476   : > { %s1442_s17 = smov %s1435_s30 }
 0x479   :  { %607 = vsyncpa [#allocation6], 1 }
 0x47a   :  { %609 = vsyncpa [#allocation6 + $0x1], 1 }
 0x47b   :  { %610 = vsyncpa [#allocation9], 1 }
 0x47c   :  { %612 = vsyncpa [#allocation9 + $0x1], 1 }
 0x47d   :  { %613 = vsyncpa [#allocation7], 1 }
 0x47e   :  { %615 = vsyncpa [#allocation7 + $0x1], 1 }
 0x47f   :  { %616 = vsyncpa [#allocation13], 1 }
 0x480   :  { %618 = vsyncpa [#allocation13 + $0x1], 1 }

</bundles_post_ra>
